<compile_context>
chip_gen: v7x
topology: tpu7x:2x2x1
jax: 0.10.0
libtpu: 0.0.40
codegen_flags: <defaults>
</compile_context>

<pallas_src>
import jax
import jax.numpy as jnp
from jax.experimental import pallas as pl
from jax.experimental.pallas import tpu as pltpu

# ---------------- model dimensions (small, consistent with the module) -------
BATCH = 8
VOCAB_SIZE = 68          # char-level vocab for the book excerpt
EMBED_DIM = 128          # scaled-down embed_dim
HIDDEN = 128             # scaled-down rnn_hidden_size
VOCAB_PADDED = 128       # lane-dense fc output (next multiple of 128)


# ------------------------------- Pallas kernel -------------------------------
def lstm_step_fc_kernel(ids_ref,       # SMEM (B,)      int32 token ids
                        h_ref,         # VMEM (B, H)    f32
                        c_ref,         # VMEM (B, H)    f32
                        emb_ref,       # VMEM (V, E)    f32  embedding table
                        wg_ref,        # VMEM (E+H, 4H) bf16 fused [W_ih^T; W_hh^T]
                        bg_ref,        # VMEM (1, 4H)   f32  b_ih + b_hh
                        wfc_ref,       # VMEM (H, Vp)   bf16 fc weight (padded)
                        bfc_ref,       # VMEM (1, Vp)   f32  fc bias (padded)
                        logits_ref,    # VMEM (B, Vp)   f32
                        h_out_ref,     # VMEM (B, H)    f32
                        c_out_ref,     # VMEM (B, H)    f32
                        xcat_ref):     # VMEM scratch (B, E+H) f32
    B, H = h_ref.shape
    E = emb_ref.shape[1]

    # In-kernel embedding gather: one dynamic-offset row load per batch element.
    for b in range(B):
        tok = ids_ref[b]
        xcat_ref[pl.ds(b, 1), pl.ds(0, E)] = emb_ref[pl.ds(tok, 1), :]
    # Recurrent input fills the second half of the fused activation [x_emb | h].
    xcat_ref[:, E:] = h_ref[...]

    # Single fused gate matmul: (B, E+H) @ (E+H, 4H); bf16 MXU inputs, f32 acc.
    gates = (jnp.dot(xcat_ref[...].astype(jnp.bfloat16), wg_ref[...],
                     preferred_element_type=jnp.float32)
             + bg_ref[...])

    # PyTorch LSTM gate order: i, f, g, o.  Elementwise / transcendentals in f32.
    i_g = jax.nn.sigmoid(gates[:, 0 * H:1 * H])
    f_g = jax.nn.sigmoid(gates[:, 1 * H:2 * H])
    g_g = jnp.tanh(gates[:, 2 * H:3 * H])
    o_g = jax.nn.sigmoid(gates[:, 3 * H:4 * H])

    c_new = f_g * c_ref[...] + i_g * g_g
    h_new = o_g * jnp.tanh(c_new)

    c_out_ref[...] = c_new
    h_out_ref[...] = h_new

    # fc projection to the lane-padded vocab: (B, H) @ (H, Vp), lane-dense store.
    logits_ref[...] = (jnp.dot(h_new.astype(jnp.bfloat16), wfc_ref[...],
                               preferred_element_type=jnp.float32)
                       + bfc_ref[...])


# --------------------------------- wrapper ------------------------------------
def rnn_forward(x, hidden, cell, params):
    """Equivalent of RNN.forward(x, hidden, cell) for a single timestep."""
    emb_table, wg_t, bg, wfc_t, bfc = params
    B = x.shape[0]
    V, E = emb_table.shape
    H = hidden.shape[-1]
    Vp = wfc_t.shape[-1]

    h0 = hidden[0]                                         # (B, H)
    c0 = cell[0]                                           # (B, H)

    vmem = pl.BlockSpec(memory_space=pltpu.MemorySpace.VMEM)
    smem = pl.BlockSpec(memory_space=pltpu.MemorySpace.SMEM)

    flops = 2 * B * (E + H) * 4 * H + 2 * B * H * Vp
    bytes_accessed = (wg_t.size * 2 + wfc_t.size * 2 + emb_table.size * 4
                      + 4 * (h0.size + c0.size) * 4 + B * Vp * 4)

    logits_p, h_new, c_new = pl.pallas_call(
        lstm_step_fc_kernel,
        out_shape=(
            jax.ShapeDtypeStruct((B, Vp), jnp.float32),    # padded logits
            jax.ShapeDtypeStruct((B, H), jnp.float32),     # new hidden
            jax.ShapeDtypeStruct((B, H), jnp.float32),     # new cell
        ),
        in_specs=[smem, vmem, vmem, vmem, vmem, vmem, vmem, vmem],
        out_specs=(vmem, vmem, vmem),
        scratch_shapes=[pltpu.VMEM((B, E + H), jnp.float32)],
        cost_estimate=pl.CostEstimate(
            flops=flops, transcendentals=5 * B * H,
            bytes_accessed=bytes_accessed),
    )(x.astype(jnp.int32), h0, c0, emb_table, wg_t, bg, wfc_t, bfc)

    logits = logits_p[:, :V]                               # drop vocab padding
    return logits, h_new[None, :, :], c_new[None, :, :]


# ----------------------------- parameter creation ----------------------------
def make_params(key, vocab_size, embed_dim, hidden, vocab_padded):
    ks = jax.random.split(key, 6)
    scale = 0.1
    emb_table = scale * jax.random.normal(ks[0], (vocab_size, embed_dim), jnp.float32)
    w_ih = scale * jax.random.normal(ks[1], (4 * hidden, embed_dim), jnp.float32)
    w_hh = scale * jax.random.normal(ks[2], (4 * hidden, hidden), jnp.float32)
    b_ih = scale * jax.random.normal(ks[3], (4 * hidden,), jnp.float32)
    b_hh = scale * jax.random.normal(ks[4], (4 * hidden,), jnp.float32)
    w_fc = scale * jax.random.normal(ks[5], (vocab_size, hidden), jnp.float32)
    b_fc = jnp.zeros((vocab_size,), jnp.float32)

    # Fused gate weight [W_ih^T; W_hh^T] : (E+H, 4H), bf16 for the MXU.
    wg_t = jnp.concatenate([w_ih.T, w_hh.T], axis=0).astype(jnp.bfloat16)
    bg = (b_ih + b_hh)[None, :]                            # (1, 4H) f32

    # fc weight / bias padded to the lane-dense vocab width.
    wfc_t = (jnp.zeros((hidden, vocab_padded), jnp.float32)
             .at[:, :vocab_size].set(w_fc.T)).astype(jnp.bfloat16)
    bfc = jnp.zeros((1, vocab_padded), jnp.float32).at[0, :vocab_size].set(b_fc)

    return (emb_table, wg_t, bg, wfc_t, bfc)


if __name__ == "__main__":
    key = jax.random.PRNGKey(0)
    k_par, k_x = jax.random.split(key)

    params = make_params(k_par, VOCAB_SIZE, EMBED_DIM, HIDDEN, VOCAB_PADDED)

    # inputs: token ids + zero-initialized hidden/cell (init_hidden equivalent)
    x = jax.random.randint(k_x, (BATCH,), 0, VOCAB_SIZE, dtype=jnp.int32)
    hidden = jnp.zeros((1, BATCH, HIDDEN), jnp.float32)
    cell = jnp.zeros((1, BATCH, HIDDEN), jnp.float32)

    logits, h_new, c_new = rnn_forward(x, hidden, cell, params)
    jax.block_until_ready((logits, h_new, c_new))

    assert logits.shape == (BATCH, VOCAB_SIZE)
    assert h_new.shape == (1, BATCH, HIDDEN)
    assert c_new.shape == (1, BATCH, HIDDEN)
    assert bool(jnp.all(jnp.isfinite(logits)))
    print("KERNEL_OK")
</pallas_src>

<mosaic_0001>
module attributes {stable_mosaic.version = 11 : i64} {
  func.func @lstm_step_fc_kernel(%arg0: memref<8xi32, #tpu.memory_space<smem>>, %arg1: memref<8x128xf32, #tpu.memory_space<vmem>>, %arg2: memref<8x128xf32, #tpu.memory_space<vmem>>, %arg3: memref<68x128xf32, #tpu.memory_space<vmem>>, %arg4: memref<256x512xbf16, #tpu.memory_space<vmem>>, %arg5: memref<1x512xf32, #tpu.memory_space<vmem>>, %arg6: memref<128x128xbf16, #tpu.memory_space<vmem>>, %arg7: memref<1x128xf32, #tpu.memory_space<vmem>>, %arg8: memref<8x128xf32, #tpu.memory_space<vmem>>, %arg9: memref<8x128xf32, #tpu.memory_space<vmem>>, %arg10: memref<8x128xf32, #tpu.memory_space<vmem>>, %arg11: memref<8x256xf32, #tpu.memory_space<vmem>>) attributes {dimension_semantics = [], scalar_prefetch = 0 : i64, scratch_operands = 1 : i64, tpu.core_type = #tpu.core_type<tc>} {
    %c0 = arith.constant 0 : index
    %0 = memref.load %arg0[%c0] : memref<8xi32, #tpu.memory_space<smem>>
    %1 = arith.index_cast %0 : i32 to index
    %c0_0 = arith.constant 0 : index
    %2 = vector.load %arg3[%1, %c0_0] : memref<68x128xf32, #tpu.memory_space<vmem>>, vector<1x128xf32>
    %c0_1 = arith.constant 0 : index
    %c0_2 = arith.constant 0 : index
    %3 = vector.load %arg11[%c0_1, %c0_2] : memref<8x256xf32, #tpu.memory_space<vmem>>, vector<1x128xf32>
    tpu.vector_store %arg11[%c0_1, %c0_2], %2 {strides = array<i32>} : memref<8x256xf32, #tpu.memory_space<vmem>>, vector<1x128xf32>,
    %c1 = arith.constant 1 : index
    %4 = memref.load %arg0[%c1] : memref<8xi32, #tpu.memory_space<smem>>
    %5 = arith.index_cast %4 : i32 to index
    %c0_3 = arith.constant 0 : index
    %6 = vector.load %arg3[%5, %c0_3] : memref<68x128xf32, #tpu.memory_space<vmem>>, vector<1x128xf32>
    %c1_4 = arith.constant 1 : index
    %c0_5 = arith.constant 0 : index
    %7 = vector.load %arg11[%c1_4, %c0_5] : memref<8x256xf32, #tpu.memory_space<vmem>>, vector<1x128xf32>
    tpu.vector_store %arg11[%c1_4, %c0_5], %6 {strides = array<i32>} : memref<8x256xf32, #tpu.memory_space<vmem>>, vector<1x128xf32>,
    %c2 = arith.constant 2 : index
    %8 = memref.load %arg0[%c2] : memref<8xi32, #tpu.memory_space<smem>>
    %9 = arith.index_cast %8 : i32 to index
    %c0_6 = arith.constant 0 : index
    %10 = vector.load %arg3[%9, %c0_6] : memref<68x128xf32, #tpu.memory_space<vmem>>, vector<1x128xf32>
    %c2_7 = arith.constant 2 : index
    %c0_8 = arith.constant 0 : index
    %11 = vector.load %arg11[%c2_7, %c0_8] : memref<8x256xf32, #tpu.memory_space<vmem>>, vector<1x128xf32>
    tpu.vector_store %arg11[%c2_7, %c0_8], %10 {strides = array<i32>} : memref<8x256xf32, #tpu.memory_space<vmem>>, vector<1x128xf32>,
    %c3 = arith.constant 3 : index
    %12 = memref.load %arg0[%c3] : memref<8xi32, #tpu.memory_space<smem>>
    %13 = arith.index_cast %12 : i32 to index
    %c0_9 = arith.constant 0 : index
    %14 = vector.load %arg3[%13, %c0_9] : memref<68x128xf32, #tpu.memory_space<vmem>>, vector<1x128xf32>
    %c3_10 = arith.constant 3 : index
    %c0_11 = arith.constant 0 : index
    %15 = vector.load %arg11[%c3_10, %c0_11] : memref<8x256xf32, #tpu.memory_space<vmem>>, vector<1x128xf32>
    tpu.vector_store %arg11[%c3_10, %c0_11], %14 {strides = array<i32>} : memref<8x256xf32, #tpu.memory_space<vmem>>, vector<1x128xf32>,
    %c4 = arith.constant 4 : index
    %16 = memref.load %arg0[%c4] : memref<8xi32, #tpu.memory_space<smem>>
    %17 = arith.index_cast %16 : i32 to index
    %c0_12 = arith.constant 0 : index
    %18 = vector.load %arg3[%17, %c0_12] : memref<68x128xf32, #tpu.memory_space<vmem>>, vector<1x128xf32>
    %c4_13 = arith.constant 4 : index
    %c0_14 = arith.constant 0 : index
    %19 = vector.load %arg11[%c4_13, %c0_14] : memref<8x256xf32, #tpu.memory_space<vmem>>, vector<1x128xf32>
    tpu.vector_store %arg11[%c4_13, %c0_14], %18 {strides = array<i32>} : memref<8x256xf32, #tpu.memory_space<vmem>>, vector<1x128xf32>,
    %c5 = arith.constant 5 : index
    %20 = memref.load %arg0[%c5] : memref<8xi32, #tpu.memory_space<smem>>
    %21 = arith.index_cast %20 : i32 to index
    %c0_15 = arith.constant 0 : index
    %22 = vector.load %arg3[%21, %c0_15] : memref<68x128xf32, #tpu.memory_space<vmem>>, vector<1x128xf32>
    %c5_16 = arith.constant 5 : index
    %c0_17 = arith.constant 0 : index
    %23 = vector.load %arg11[%c5_16, %c0_17] : memref<8x256xf32, #tpu.memory_space<vmem>>, vector<1x128xf32>
    tpu.vector_store %arg11[%c5_16, %c0_17], %22 {strides = array<i32>} : memref<8x256xf32, #tpu.memory_space<vmem>>, vector<1x128xf32>,
    %c6 = arith.constant 6 : index
    %24 = memref.load %arg0[%c6] : memref<8xi32, #tpu.memory_space<smem>>
    %25 = arith.index_cast %24 : i32 to index
    %c0_18 = arith.constant 0 : index
    %26 = vector.load %arg3[%25, %c0_18] : memref<68x128xf32, #tpu.memory_space<vmem>>, vector<1x128xf32>
    %c6_19 = arith.constant 6 : index
    %c0_20 = arith.constant 0 : index
    %27 = vector.load %arg11[%c6_19, %c0_20] : memref<8x256xf32, #tpu.memory_space<vmem>>, vector<1x128xf32>
    tpu.vector_store %arg11[%c6_19, %c0_20], %26 {strides = array<i32>} : memref<8x256xf32, #tpu.memory_space<vmem>>, vector<1x128xf32>,
    %c7 = arith.constant 7 : index
    %28 = memref.load %arg0[%c7] : memref<8xi32, #tpu.memory_space<smem>>
    %29 = arith.index_cast %28 : i32 to index
    %c0_21 = arith.constant 0 : index
    %30 = vector.load %arg3[%29, %c0_21] : memref<68x128xf32, #tpu.memory_space<vmem>>, vector<1x128xf32>
    %c7_22 = arith.constant 7 : index
    %c0_23 = arith.constant 0 : index
    %31 = vector.load %arg11[%c7_22, %c0_23] : memref<8x256xf32, #tpu.memory_space<vmem>>, vector<1x128xf32>
    tpu.vector_store %arg11[%c7_22, %c0_23], %30 {strides = array<i32>} : memref<8x256xf32, #tpu.memory_space<vmem>>, vector<1x128xf32>,
    %c0_24 = arith.constant 0 : index
    %c0_25 = arith.constant 0 : index
    %32 = vector.load %arg1[%c0_24, %c0_25] : memref<8x128xf32, #tpu.memory_space<vmem>>, vector<8x128xf32>
    %c0_26 = arith.constant 0 : index
    %c128 = arith.constant 128 : index
    %33 = vector.load %arg11[%c0_26, %c128] : memref<8x256xf32, #tpu.memory_space<vmem>>, vector<8x128xf32>
    tpu.vector_store %arg11[%c0_26, %c128], %32 {strides = array<i32>} : memref<8x256xf32, #tpu.memory_space<vmem>>, vector<8x128xf32>,
    %c0_27 = arith.constant 0 : index
    %c0_28 = arith.constant 0 : index
    %34 = vector.load %arg11[%c0_27, %c0_28] : memref<8x256xf32, #tpu.memory_space<vmem>>, vector<8x256xf32>
    %35 = arith.truncf %34 : vector<8x256xf32> to vector<8x256xbf16>
    %c0_29 = arith.constant 0 : index
    %c0_30 = arith.constant 0 : index
    %36 = vector.load %arg4[%c0_29, %c0_30] : memref<256x512xbf16, #tpu.memory_space<vmem>>, vector<256x512xbf16>
    %cst = arith.constant dense<0.000000e+00> : vector<8x512xf32>
    %37 = tpu.matmul %35, %36, %cst {dimension_numbers = #tpu.dot_dimension_numbers<[1], [0], [0], [1], [0, 0, 1, 1], [], []>} : vector<8x256xbf16>, vector<256x512xbf16>, vector<8x512xf32> -> vector<8x512xf32>
    %c0_31 = arith.constant 0 : index
    %c0_32 = arith.constant 0 : index
    %38 = vector.load %arg5[%c0_31, %c0_32] : memref<1x512xf32, #tpu.memory_space<vmem>>, vector<1x512xf32>
    %39 = vector.broadcast %38 : vector<1x512xf32> to vector<8x512xf32>
    %40 = arith.addf %37, %39 : vector<8x512xf32>
    %41 = vector.extract_strided_slice %40 {offsets = [0, 0], sizes = [8, 128], strides = [1, 1]} : vector<8x512xf32> to vector<8x128xf32>
    %42 = arith.negf %41 : vector<8x128xf32>
    %43 = math.exp %42 : vector<8x128xf32>
    %cst_33 = arith.constant 1.000000e+00 : f32
    %44 = vector.broadcast %cst_33 : f32 to vector<8x128xf32>
    %45 = arith.addf %44, %43 : vector<8x128xf32>
    %46 = arith.divf %44, %45 : vector<8x128xf32>
    %47 = vector.extract_strided_slice %40 {offsets = [0, 128], sizes = [8, 128], strides = [1, 1]} : vector<8x512xf32> to vector<8x128xf32>
    %48 = arith.negf %47 : vector<8x128xf32>
    %49 = math.exp %48 : vector<8x128xf32>
    %cst_34 = arith.constant 1.000000e+00 : f32
    %50 = vector.broadcast %cst_34 : f32 to vector<8x128xf32>
    %51 = arith.addf %50, %49 : vector<8x128xf32>
    %52 = arith.divf %50, %51 : vector<8x128xf32>
    %53 = vector.extract_strided_slice %40 {offsets = [0, 256], sizes = [8, 128], strides = [1, 1]} : vector<8x512xf32> to vector<8x128xf32>
    %54 = math.tanh %53 : vector<8x128xf32>
    %55 = vector.extract_strided_slice %40 {offsets = [0, 384], sizes = [8, 128], strides = [1, 1]} : vector<8x512xf32> to vector<8x128xf32>
    %56 = arith.negf %55 : vector<8x128xf32>
    %57 = math.exp %56 : vector<8x128xf32>
    %cst_35 = arith.constant 1.000000e+00 : f32
    %58 = vector.broadcast %cst_35 : f32 to vector<8x128xf32>
    %59 = arith.addf %58, %57 : vector<8x128xf32>
    %60 = arith.divf %58, %59 : vector<8x128xf32>
    %c0_36 = arith.constant 0 : index
    %c0_37 = arith.constant 0 : index
    %61 = vector.load %arg2[%c0_36, %c0_37] : memref<8x128xf32, #tpu.memory_space<vmem>>, vector<8x128xf32>
    %62 = arith.mulf %52, %61 : vector<8x128xf32>
    %63 = arith.mulf %46, %54 : vector<8x128xf32>
    %64 = arith.addf %62, %63 : vector<8x128xf32>
    %65 = math.tanh %64 : vector<8x128xf32>
    %66 = arith.mulf %60, %65 : vector<8x128xf32>
    %c0_38 = arith.constant 0 : index
    %c0_39 = arith.constant 0 : index
    %67 = vector.load %arg10[%c0_38, %c0_39] : memref<8x128xf32, #tpu.memory_space<vmem>>, vector<8x128xf32>
    tpu.vector_store %arg10[%c0_38, %c0_39], %64 {strides = array<i32>} : memref<8x128xf32, #tpu.memory_space<vmem>>, vector<8x128xf32>,
    %c0_40 = arith.constant 0 : index
    %c0_41 = arith.constant 0 : index
    %68 = vector.load %arg9[%c0_40, %c0_41] : memref<8x128xf32, #tpu.memory_space<vmem>>, vector<8x128xf32>
    tpu.vector_store %arg9[%c0_40, %c0_41], %66 {strides = array<i32>} : memref<8x128xf32, #tpu.memory_space<vmem>>, vector<8x128xf32>,
    %69 = arith.truncf %66 : vector<8x128xf32> to vector<8x128xbf16>
    %c0_42 = arith.constant 0 : index
    %c0_43 = arith.constant 0 : index
    %70 = vector.load %arg6[%c0_42, %c0_43] : memref<128x128xbf16, #tpu.memory_space<vmem>>, vector<128x128xbf16>
    %cst_44 = arith.constant dense<0.000000e+00> : vector<8x128xf32>
    %71 = tpu.matmul %69, %70, %cst_44 {dimension_numbers = #tpu.dot_dimension_numbers<[1], [0], [0], [1], [0, 0, 1, 1], [], []>} : vector<8x128xbf16>, vector<128x128xbf16>, vector<8x128xf32> -> vector<8x128xf32>
    %c0_45 = arith.constant 0 : index
    %c0_46 = arith.constant 0 : index
    %72 = vector.load %arg7[%c0_45, %c0_46] : memref<1x128xf32, #tpu.memory_space<vmem>>, vector<1x128xf32>
    %73 = vector.broadcast %72 : vector<1x128xf32> to vector<8x128xf32>
    %74 = arith.addf %71, %73 : vector<8x128xf32>
    %c0_47 = arith.constant 0 : index
    %c0_48 = arith.constant 0 : index
    %75 = vector.load %arg8[%c0_47, %c0_48] : memref<8x128xf32, #tpu.memory_space<vmem>>, vector<8x128xf32>
    tpu.vector_store %arg8[%c0_47, %c0_48], %74 {strides = array<i32>} : memref<8x128xf32, #tpu.memory_space<vmem>>, vector<8x128xf32>,
    return
  }
}

</mosaic_0001>

<bundles_post_ra>
// kernel: tpu_custom_call.1
= control target key start
LH: loop header
LB: loop body
LE: loop exit
PB: predicated region body
PF: predicated region fallthrough
CT: control target
= control target key end

     0   :  { %16 = vsyncpa [#allocation6], 0  ;;  %s1493_s0 = inlined_call_operand.hbm [shape: s32[8], index: 0, kind: input, shape index: {}]   ;;  %s1494_s1 = inlined_call_operand.hbm [shape: f32[8,128], index: 1, kind: input, shape index: {}]   ;;  %s1495_s2 = inlined_call_operand.hbm [shape: f32[8,128], index: 2, kind: input, shape index: {}]   ;;  %s1496_s3 = inlined_call_operand.hbm [shape: f32[68,128], index: 3, kind: input, shape index: {}]   ;;  %s1497_s4 = inlined_call_operand.hbm [shape: bf16[256,512], index: 4, kind: input, shape index: {}]   ;;  %s1498_s5 = inlined_call_operand.vmem [shape: f32[1,512], index: 5, kind: input, shape index: {}]   ;;  %s1499_s6 = inlined_call_operand.hbm [shape: bf16[128,128], index: 6, kind: input, shape index: {}]   ;;  %s1500_s7 = inlined_call_operand.vmem [shape: f32[1,128], index: 7, kind: input, shape index: {}]   ;;  %s1501_s8 = inlined_call_operand.hbm [shape: f32[8,128], index: 8, kind: output, shape index: {0}]   ;;  %s1502_s9 = inlined_call_operand.hbm [shape: f32[8,128], index: 9, kind: output, shape index: {1}]   ;;  %s1503_s10 = inlined_call_operand.hbm [shape: f32[8,128], index: 10, kind: output, shape index: {2}]  }
   0x1   :  { %17 = vsyncpa [#allocation4], 0 }
   0x2   :  { %18 = vsyncpa [#allocation9], 0 }
   0x3   :  { %19 = vsyncpa [#allocation12], 0 }
   0x4   :  { %20 = vsyncpa [#allocation5], 0 }
   0x5   :  { %21 = vsyncpa [#allocation16], 0  ;;  %s1276_s13 = smov [#allocation8]   ;;  %s1277_s15 = smov [#allocation11]  }
   0x6   :  { %s46_s14 = sshll.u32 %s1276_s13, 4  ;;  %s67_s16 = sshll.u32 %s1277_s15, 4  ;;  %s47_s14 = int_to_ptr.vmem [resolvable:$true] %s46_s14  ;;  %s1348_s16 = int_to_ptr.vmem [resolvable:$true] %s67_s16 }
   0x7   :  { %s1078_s19 = scalar_lea.hbm %s1495_s2, 128 }
   0x8   :  { %p1079_p0 = scmp.ne.s32.totalorder %s1495_s2, %s1078_s19  ;;  %p1082_p1 = scmp.lt.u32.totalorder %s1078_s19, %s1495_s2 }
   0xa   :  { %p1084_p2 = pnand %p1082_p1, %p1079_p0 }
   0xc   :  { %1087 = shalt.err (!%p1084_p2)
}
   0xd   :  { %s1088_s24 = scalar_lea.vmem %s47_s14, 128  ;;  %p1093_p4 = scmp.lt.s32.totalorder %s47_s14, %s47_s14 }
   0xe   :  { %p1089_p3 = scmp.ne.s32.totalorder %s47_s14, %s1088_s24  ;;  %p1094_p5 = scmp.lt.s32.totalorder %s1088_s24, %s1088_s24 }
  0x10   :  { %p1095_p6 = por %p1094_p5, %p1093_p4 }
  0x12   :  { %p1096_p7 = pnand %p1095_p6, %p1089_p3 }
  0x14   :  { %1099 = shalt.err (!%p1096_p7)
}
  0x15   :  { %49 = dma.hbm_to_vmem [thread:$0]  %s1495_s2, 128, %s47_s14, [#allocation9]  }
  0x16   :  { %s1100_s29 = scalar_lea.hbm %s1497_s4, 8192 }
  0x17   :  { %p1101_p8 = scmp.ne.s32.totalorder %s1497_s4, %s1100_s29  ;;  %p1104_p9 = scmp.lt.u32.totalorder %s1100_s29, %s1497_s4 }
  0x19   :  { %p1106_p10 = pnand %p1104_p9, %p1101_p8 }
  0x1b   :  { %1109 = shalt.err (!%p1106_p10)
}
  0x1c   :  { %s1110_s15 = scalar_lea.vmem %s1348_s16, 8192  ;;  %p1115_p12 = scmp.lt.s32.totalorder %s1348_s16, %s1348_s16 }
  0x1d   :  { %p1111_p11 = scmp.ne.s32.totalorder %s1348_s16, %s1110_s15  ;;  %p1116_p13 = scmp.lt.s32.totalorder %s1110_s15, %s1110_s15 }
  0x1f   :  { %p1117_p0 = por %p1116_p13, %p1115_p12 }
  0x21   :  { %p1118_p1 = pnand %p1117_p0, %p1111_p11 }
  0x23   :  { %1121 = shalt.err (!%p1118_p1)
}
  0x24   :  { %s1278_s2 = smov 256   ;;  %s1279_s14 = smov 16  }
  0x25   :  { %73 = dma.hbm_to_vmem [thread:$0]  %s1497_s4, 8192, %s1348_s16, [#allocation12], %s1278_s2, %s1278_s2, %s1279_s14  }
  0x26   :  { %s1122_s21 = scalar_lea.hbm %s1493_s0, 16 }
  0x27   :  { %p1123_p2 = scmp.ne.s32.totalorder %s1493_s0, %s1122_s21  ;;  %p1126_p3 = scmp.lt.u32.totalorder %s1122_s21, %s1493_s0 }
  0x29   :  { %p1128_p4 = pnand %p1126_p3, %p1123_p2 }
  0x2b   :  { %1131 = shalt.err (!%p1128_p4)
}
  0x2c   :  { %s1280_s26 = smov [#allocation3]   ;;  %s1281_s4 = smov [#allocation7]  }
  0x2d   :  { %29 = dma.hbm_to_smem %s1493_s0, 16, %s1280_s26, [#allocation6]  }
  0x2e   :  { %s36_s16 = sshll.u32 %s1281_s4, 4  ;;  %s1282_s29 = smov [#allocation10]   ;;  %s37_s16 = int_to_ptr.vmem [resolvable:$true] %s36_s16 }
  0x2f   :  { %s55_s30 = sshll.u32 %s1282_s29, 4  ;;  %s1132_s13 = scalar_lea.hbm %s1494_s1, 128  ;;  %s56_s30 = int_to_ptr.vmem [resolvable:$true] %s55_s30 }
  0x30   :  { %p1133_p5 = scmp.ne.s32.totalorder %s1494_s1, %s1132_s13  ;;  %p1136_p6 = scmp.lt.u32.totalorder %s1132_s13, %s1494_s1 }
  0x32   :  { %p1138_p7 = pnand %p1136_p6, %p1133_p5 }
  0x34   :  { %1141 = shalt.err (!%p1138_p7)
}
  0x35   :  { %s1142_s0 = scalar_lea.vmem %s37_s16, 128  ;;  %p1147_p9 = scmp.lt.s32.totalorder %s37_s16, %s37_s16 }
  0x36   :  { %p1143_p8 = scmp.ne.s32.totalorder %s37_s16, %s1142_s0  ;;  %p1148_p10 = scmp.lt.s32.totalorder %s1142_s0, %s1142_s0 }
  0x38   :  { %p1149_p11 = por %p1148_p10, %p1147_p9 }
  0x3a   :  { %p1150_p12 = pnand %p1149_p11, %p1143_p8 }
  0x3c   :  { %1153 = shalt.err (!%p1150_p12)
}
  0x3d   :  { %39 = dma.hbm_to_vmem [thread:$0]  %s1494_s1, 128, %s37_s16, [#allocation4]  }
  0x3e   :  { %s1154_s22 = scalar_lea.hbm %s1496_s3, 1152 }
  0x3f   :  { %p1155_p13 = scmp.ne.s32.totalorder %s1496_s3, %s1154_s22  ;;  %p1158_p0 = scmp.lt.u32.totalorder %s1154_s22, %s1496_s3 }
  0x41   :  { %p1160_p1 = pnand %p1158_p0, %p1155_p13 }
  0x43   :  { %1163 = shalt.err (!%p1160_p1)
}
  0x44   :  { %s1164_s27 = scalar_lea.vmem %s56_s30, 1152  ;;  %p1169_p3 = scmp.lt.s32.totalorder %s56_s30, %s56_s30 }
  0x45   :  { %p1165_p2 = scmp.ne.s32.totalorder %s56_s30, %s1164_s27  ;;  %p1170_p4 = scmp.lt.s32.totalorder %s1164_s27, %s1164_s27 }
  0x47   :  { %p1171_p5 = por %p1170_p4, %p1169_p3 }
  0x49   :  { %p1172_p6 = pnand %p1171_p5, %p1165_p2 }
  0x4b   :  { %1175 = shalt.err (!%p1172_p6)
}
  0x4c   :  { %s1283_s1 = smov 128   ;;  %s1284_s28 = smov 8  }
  0x4d   :  { %61 = dma.hbm_to_vmem [thread:$0]  %s1496_s3, 1152, %s56_s30, [#allocation9], %s1283_s1, %s1283_s1, %s1284_s28  }
  0x4e   :  { %s1285_s29 = smov [#allocation13]   ;;  %s1176_s15 = scalar_lea.hbm %s1499_s6, 1024 }
  0x4f   :  { %s81_s11 = sshll.u32 %s1285_s29, 4  ;;  %p1177_p7 = scmp.ne.s32.totalorder %s1499_s6, %s1176_s15  ;;  %s82_s11 = int_to_ptr.vmem [resolvable:$true] %s81_s11 }
  0x50   :  { %p1180_p8 = scmp.lt.u32.totalorder %s1176_s15, %s1499_s6 }
  0x52   :  { %p1182_p9 = pnand %p1180_p8, %p1177_p7 }
  0x54   :  { %1185 = shalt.err (!%p1182_p9)
}
  0x55   :  { %s1186_s18 = scalar_lea.vmem %s82_s11, 1024  ;;  %p1191_p11 = scmp.lt.s32.totalorder %s82_s11, %s82_s11 }
  0x56   :  { %p1187_p10 = scmp.ne.s32.totalorder %s82_s11, %s1186_s18  ;;  %p1192_p12 = scmp.lt.s32.totalorder %s1186_s18, %s1186_s18 }
  0x58   :  { %p1193_p13 = por %p1192_p12, %p1191_p11 }
  0x5a   :  { %p1194_p0 = pnand %p1193_p13, %p1187_p10 }
  0x5c   :  { %1197 = shalt.err (!%p1194_p0)
}
  0x5d   :  { %s1286_s3 = smov 64   ;;  %s1287_s30 = smov 4  }
  0x5e   :  { %87 = dma.hbm_to_vmem [thread:$0]  %s1499_s6, 1024, %s82_s11, [#allocation12], %s1286_s3, %s1286_s3, %s1287_s30  }
  0x5f   :  { %1264 = dma.done.wait [#allocation6], 16  }
  0x60   :  { %1265 = vsyncadd [#allocation6], 4294967280 }
  0x61   :  { %1266 = dma.done.wait [#allocation4], 128  }
  0x62   :  { %1267 = vsyncadd [#allocation4], 4294967168 }
  0x63   :  { %1268 = dma.done.wait [#allocation9], 1280  }
  0x64   :  { %1269 = vsyncadd [#allocation9], 4294966016 }
  0x65   :  { %1270 = dma.done.wait [#allocation12], 9216  }
  0x66   :  { %1271 = vsyncadd [#allocation12], 4294958080 }
  0x67   :  { %108 = sfence }
  0x68   :  { %v958_v0 = vld [vmem:[#allocation11 + $0x4] ss:$16 sps:$4 sm:$0xff]   ;;  %v960_v1 = vld [vmem:[#allocation11] ss:$16 sps:$4 sm:$0xff]   ;;  %v969_v5 = vld [vmem:[#allocation11 + $0xc] ss:$16 sps:$4 sm:$0xff]  }
  0x69   :  { %554 = vmatprep.subr.bf16.mxu0 %v958_v0  ;;  %v961_v2 = vld [vmem:[#allocation11 + $0x24] ss:$16 sps:$4 sm:$0xff]   ;;  %v963_v3 = vld [vmem:[#allocation11 + $0x20] ss:$16 sps:$4 sm:$0xff]   ;;  %v972_v6 = vld [vmem:[#allocation11 + $0x8] ss:$16 sps:$4 sm:$0xff]   ;;  %595 = vmatprep.subr.bf16.mxu1 %v969_v5 }
  0x6a   :  { %555 = vmatpush1.bf16.msra.mxu0 %v960_v1  ;;  %v964_v4 = vld [vmem:[#allocation11 + $0x44] ss:$16 sps:$4 sm:$0xff]   ;;  %v966_v7 = vld [vmem:[#allocation11 + $0x40] ss:$16 sps:$4 sm:$0xff]   ;;  %596 = vmatpush1.bf16.msra.mxu1 %v972_v6  ;;  %v975_v9 = vld [vmem:[#allocation11 + $0x2c] ss:$16 sps:$4 sm:$0xff]  }
  0x6b   :  { %556 = vmatprep.subr.bf16.mxu0 %v961_v2  ;;  %v967_v8 = vld [vmem:[#allocation11 + $0x64] ss:$16 sps:$4 sm:$0xff]   ;;  %v978_v10 = vld [vmem:[#allocation11 + $0x28] ss:$16 sps:$4 sm:$0xff]   ;;  %597 = vmatprep.subr.bf16.mxu1 %v975_v9  ;;  %v971_v11 = vld [vmem:[#allocation11 + $0x60] ss:$16 sps:$4 sm:$0xff]  }
  0x6c   :  { %v973_v12 = vld [vmem:[#allocation11 + $0x84] ss:$16 sps:$4 sm:$0xff]   ;;  %v981_v13 = vld [vmem:[#allocation11 + $0x4c] ss:$16 sps:$4 sm:$0xff]   ;;  %v984_v14 = vld [vmem:[#allocation11 + $0x48] ss:$16 sps:$4 sm:$0xff]  }
  0x6d   :  { %v987_v15 = vld [vmem:[#allocation11 + $0x6c] ss:$16 sps:$4 sm:$0xff]   ;;  %v977_v16 = vld [vmem:[#allocation11 + $0x80] ss:$16 sps:$4 sm:$0xff]   ;;  %v979_v17 = vld [vmem:[#allocation11 + $0xa4] ss:$16 sps:$4 sm:$0xff]  }
  0x6e   :  { %557 = vmatpush1.bf16.msra.mxu0 %v963_v3  ;;  %598 = vmatpush1.bf16.msra.mxu1 %v978_v10  ;;  %v990_v18 = vld [vmem:[#allocation11 + $0x68] ss:$16 sps:$4 sm:$0xff]   ;;  %v993_v19 = vld [vmem:[#allocation11 + $0x8c] ss:$16 sps:$4 sm:$0xff]   ;;  %v983_v20 = vld [vmem:[#allocation11 + $0xa0] ss:$16 sps:$4 sm:$0xff]  }
  0x6f   :  { %558 = vmatprep.subr.bf16.mxu0 %v964_v4  ;;  %599 = vmatprep.subr.bf16.mxu1 %v981_v13  ;;  %v985_v21 = vld [vmem:[#allocation11 + $0xc4] ss:$16 sps:$4 sm:$0xff]   ;;  %v996_v22 = vld [vmem:[#allocation11 + $0x88] ss:$16 sps:$4 sm:$0xff]   ;;  %v999_v23 = vld [vmem:[#allocation11 + $0xac] ss:$16 sps:$4 sm:$0xff]  }
  0x70   :  { %v989_v24 = vld [vmem:[#allocation11 + $0xc0] ss:$16 sps:$4 sm:$0xff]   ;;  %s1427_s6 = sld [smem:[#allocation3]]  ;;  %v991_v25 = vld [vmem:[#allocation11 + $0xe4] ss:$16 sps:$4 sm:$0xff]   ;;  %s1429_s21 = sld [smem:[#allocation3 + $0x1]] }
  0x71   :  { %v1002_v26 = vld [vmem:[#allocation11 + $0xa8] ss:$16 sps:$4 sm:$0xff]   ;;  %v1005_v27 = vld [vmem:[#allocation11 + $0xcc] ss:$16 sps:$4 sm:$0xff]   ;;  %s1431_s22 = sld [smem:[#allocation3 + $0x2]]  ;;  %s1433_s23 = sld [smem:[#allocation3 + $0x3]] }
  0x72   :  { %559 = vmatpush1.bf16.msra.mxu0 %v966_v7  ;;  %600 = vmatpush1.bf16.msra.mxu1 %v984_v14  ;;  %v995_v28 = vld [vmem:[#allocation11 + $0xe0] ss:$16 sps:$4 sm:$0xff]   ;;  %v997_v29 = vld [vmem:[#allocation11 + $0x104] ss:$16 sps:$4 sm:$0xff]   ;;  %s1435_s24 = sld [smem:[#allocation3 + $0x4]]  ;;  %s1437_s25 = sld [smem:[#allocation3 + $0x5]] }
  0x73   :  { %560 = vmatprep.subr.bf16.mxu0 %v967_v8  ;;  %601 = vmatprep.subr.bf16.mxu1 %v987_v15  ;;  %v1008_v30 = vld [vmem:[#allocation11 + $0xc8] ss:$16 sps:$4 sm:$0xff]   ;;  %v1011_v31 = vld [vmem:[#allocation11 + $0xec] ss:$16 sps:$4 sm:$0xff]   ;;  %s1439_s26 = sld [smem:[#allocation3 + $0x6]]  ;;  %s1441_s27 = sld [smem:[#allocation3 + $0x7]] }
  0x74   :  { %v1001_v32 = vld [vmem:[#allocation11 + $0x100] ss:$16 sps:$4 sm:$0xff]   ;;  %v1003_v33 = vld [vmem:[#allocation11 + $0x124] ss:$16 sps:$4 sm:$0xff]   ;;  %v1014_v34 = vld [vmem:[#allocation11 + $0xe8] ss:$16 sps:$4 sm:$0xff]  }
  0x75   :  { %v1017_v35 = vld [vmem:[#allocation11 + $0x10c] ss:$16 sps:$4 sm:$0xff]   ;;  %v1007_v36 = vld [vmem:[#allocation11 + $0x120] ss:$16 sps:$4 sm:$0xff]   ;;  %v1009_v37 = vld [vmem:[#allocation11 + $0x144] ss:$16 sps:$4 sm:$0xff]  }
  0x76   :  { %561 = vmatpush1.bf16.msra.mxu0 %v971_v11  ;;  %602 = vmatpush1.bf16.msra.mxu1 %v990_v18  ;;  %v1020_v38 = vld [vmem:[#allocation11 + $0x108] ss:$16 sps:$4 sm:$0xff]   ;;  %v1013_v39 = vld [vmem:[#allocation11 + $0x140] ss:$16 sps:$4 sm:$0xff]   ;;  %v1023_v40 = vld [vmem:[#allocation11 + $0x12c] ss:$16 sps:$4 sm:$0xff]  }
  0x77   :  { %562 = vmatprep.subr.bf16.mxu0 %v973_v12  ;;  %603 = vmatprep.subr.bf16.mxu1 %v993_v19  ;;  %v1015_v41 = vld [vmem:[#allocation11 + $0x164] ss:$16 sps:$4 sm:$0xff]   ;;  %v1026_v42 = vld [vmem:[#allocation11 + $0x128] ss:$16 sps:$4 sm:$0xff]   ;;  %v1029_v44 = vld [vmem:[#allocation11 + $0x14c] ss:$16 sps:$4 sm:$0xff]  }
  0x78   :  { %v142_v43 = vld [vmem:[#allocation7] sm:$0xff]  ;;  %s111_s1 = scalar_lea.vmem [#allocation10], %s1427_s6  ;;  %s115_s28 = scalar_lea.vmem [#allocation10], %s1429_s21  ;;  %v1019_v54 = vld [vmem:[#allocation11 + $0x160] ss:$16 sps:$4 sm:$0xff]   ;;  %v1288_v13 = vmov 0.0  }
  0x79   :  { %v147_v45 = vpack.c.bf16 %v142_v43, %v142_v43  ;;  %v112_v46 = vld [vmem:[%s111_s1] sm:$0x1]  ;;  %s119_s4 = scalar_lea.vmem [#allocation10], %s1431_s22  ;;  %s123_s16 = scalar_lea.vmem [#allocation10], %s1433_s23  ;;  %v1021_v55 = vld [vmem:[#allocation11 + $0x184] ss:$16 sps:$4 sm:$0xff]  }
  0x7a   :  { %563 = vmatpush1.bf16.msra.mxu0 %v977_v16  ;;  %604 = vmatpush1.bf16.msra.mxu1 %v996_v22  ;;  %v116_v47 = vld [vmem:[%s115_s28] sm:$0x1]  ;;  %113 = vst [vmem:[#allocation2] sm:$0x1] %v112_v46  ;;  %s127_s29 = scalar_lea.vmem [#allocation10], %s1435_s24  ;;  %s131_s11 = scalar_lea.vmem [#allocation10], %s1437_s25 }
  0x7b   :  { %564 = vmatprep.subr.bf16.mxu0 %v979_v17  ;;  %605 = vmatprep.subr.bf16.mxu1 %v999_v23  ;;  %v120_v48 = vld [vmem:[%s119_s4] sm:$0x1]  ;;  %117 = vst [vmem:[#allocation2 + $0x1] sm:$0x1] %v116_v47  ;;  %s135_s12 = scalar_lea.vmem [#allocation10], %s1439_s26  ;;  %s139_s13 = scalar_lea.vmem [#allocation10], %s1441_s27 }
  0x7c   :  { %121 = vst [vmem:[#allocation2 + $0x2] sm:$0x1] %v120_v48  ;;  %v124_v49 = vld [vmem:[%s123_s16] sm:$0x1]  ;;  %586 = vmatprep.mubr.bf16.mxu0 %v147_v45  ;;  %627 = vmatprep.mubr.bf16.mxu1 %v147_v45  ;;  %v1032_v56 = vld [vmem:[#allocation11 + $0x148] ss:$16 sps:$4 sm:$0xff]  }
  0x7d   :  { %v128_v50 = vld [vmem:[%s127_s29] sm:$0x1]  ;;  %125 = vst [vmem:[#allocation2 + $0x3] sm:$0x1] %v124_v49  ;;  %v1035_v58 = vld [vmem:[#allocation11 + $0x16c] ss:$16 sps:$4 sm:$0xff]  }
  0x7e   :  { %565 = vmatpush1.bf16.msra.mxu0 %v983_v20  ;;  %606 = vmatpush1.bf16.msra.mxu1 %v1002_v26  ;;  %v132_v51 = vld [vmem:[%s131_s11] sm:$0x1]  ;;  %129 = vst [vmem:[#allocation2 + $0x4] sm:$0x1] %v128_v50  ;;  %v1027_v59 = vld [vmem:[#allocation11 + $0x1a4] ss:$16 sps:$4 sm:$0xff]  }
  0x7f   :  { %566 = vmatprep.subr.bf16.mxu0 %v985_v21  ;;  %607 = vmatprep.subr.bf16.mxu1 %v1005_v27  ;;  %133 = vst [vmem:[#allocation2 + $0x5] sm:$0x1] %v132_v51  ;;  %v136_v52 = vld [vmem:[%s135_s12] sm:$0x1]  ;;  %v1038_v60 = vld [vmem:[#allocation11 + $0x168] ss:$16 sps:$4 sm:$0xff]   ;;  %v214_v21 = vlaneseq }
  0x80   :  { %v140_v53 = vld [vmem:[%s139_s13] sm:$0x1]  ;;  %137 = vst [vmem:[#allocation2 + $0x6] sm:$0x1] %v136_v52  ;;  %v1041_v61 = vld [vmem:[#allocation11 + $0x18c] ss:$16 sps:$4 sm:$0xff]  }
  0x81   :  { %141 = vst [vmem:[#allocation2 + $0x7] sm:$0x1] %v140_v53  ;;  %v1025_v57 = vld [vmem:[#allocation11 + $0x180] ss:$16 sps:$4 sm:$0xff]   ;;  %v1033_v63 = vld [vmem:[#allocation11 + $0x1c4] ss:$16 sps:$4 sm:$0xff]  }
  0x82   :  { %567 = vmatpush1.bf16.msra.mxu0 %v989_v24  ;;  %608 = vmatpush1.bf16.msra.mxu1 %v1008_v30  ;;  %v1031_v62 = vld [vmem:[#allocation11 + $0x1a0] ss:$16 sps:$4 sm:$0xff]   ;;  %v1044_v0 = vld [vmem:[#allocation11 + $0x188] ss:$16 sps:$4 sm:$0xff]   ;;  %v1045_v1 = vld [vmem:[#allocation11 + $0x1ac] ss:$16 sps:$4 sm:$0xff]  }
  0x83   :  { %568 = vmatprep.subr.bf16.mxu0 %v991_v25  ;;  %609 = vmatprep.subr.bf16.mxu1 %v1011_v31  ;;  %v1037_v2 = vld [vmem:[#allocation11 + $0x1c0] ss:$16 sps:$4 sm:$0xff]   ;;  %v1039_v3 = vld [vmem:[#allocation11 + $0x1e4] ss:$16 sps:$4 sm:$0xff]   ;;  %v1047_v4 = vld [vmem:[#allocation11 + $0x1a8] ss:$16 sps:$4 sm:$0xff]  }
  0x84   :  { %v1048_v5 = vld [vmem:[#allocation11 + $0x1cc] ss:$16 sps:$4 sm:$0xff]   ;;  %v1043_v6 = vld [vmem:[#allocation11 + $0x1e0] ss:$16 sps:$4 sm:$0xff]   ;;  %v1050_v8 = vld [vmem:[#allocation11 + $0x1c8] ss:$16 sps:$4 sm:$0xff]  }
  0x85   :  { %v1051_v9 = vld [vmem:[#allocation11 + $0x1ec] ss:$16 sps:$4 sm:$0xff]   ;;  %v1053_v11 = vld [vmem:[#allocation11 + $0x1e8] ss:$16 sps:$4 sm:$0xff]   ;;  %v1054_v12 = vld [vmem:[#allocation13] sm:$0xff]   ;;  %vm1289_vm0 = vmmov 0  }
  0x86   :  { %569 = vmatpush1.bf16.msra.mxu0 %v995_v28  ;;  %610 = vmatpush1.bf16.msra.mxu1 %v1014_v34  ;;  %v1055_v14 = vld [vmem:[#allocation13 + $0x8] sm:$0xff]   ;;  %v1056_v15 = vld [vmem:[#allocation13 + $0x10] sm:$0xff]   ;;  %v1057_v16 = vld [vmem:[#allocation13 + $0x18] sm:$0xff]   ;;  %v215_v22 = vshrl.u32 %v214_v21, 7 }
  0x87   :  { %570 = vmatprep.subr.bf16.mxu0 %v997_v29  ;;  %611 = vmatprep.subr.bf16.mxu1 %v1017_v35  ;;  %v1058_v17 = vld [vmem:[#allocation13 + $0x20] sm:$0xff]   ;;  %v1059_v18 = vld [vmem:[#allocation13 + $0x28] sm:$0xff]   ;;  %v1060_v19 = vld [vmem:[#allocation13 + $0x30] sm:$0xff]  }
  0x88   :  { %v144_v7 = vld [vmem:[#allocation2] sm:$0xff]  ;;  %v216_v23 = vsub.s32 0, %v215_v22  ;;  %v212_v24 = vld [vmem:[%s1498_s5] sm:$0xf]  ;;  %v220_v25 = vsub.s32 1, %v215_v22  ;;  %v228_v28 = vsub.s32 3, %v215_v22 }
  0x89   :  { %v146_v10 = vpack.c.bf16 %v144_v7, %v144_v7  ;;  %v1061_v20 = vld [vmem:[#allocation13 + $0x38] sm:$0xff]   ;;  %v655_v53 = vld [vmem:[#allocation8] sm:$0xff]  ;;  %s1290_s5 = smov [#allocation15]  }
  0x8a   :  { %571 = vmatpush1.bf16.msra.mxu0 %v1001_v32  ;;  %612 = vmatpush1.bf16.msra.mxu1 %v1020_v38  ;;  %v217_v26 = vrot.slane %v212_v24, %v216_v23  ;;  %v221_v27 = vrot.slane %v212_v24, %v220_v25  ;;  %v224_v38 = vsub.s32 2, %v215_v22  ;;  %s792_s14 = sshll.u32 %s1290_s5, 4  ;;  %s793_s14 = int_to_ptr.vmem [resolvable:$true] %s792_s14 }
  0x8b   :  { %572 = vmatprep.subr.bf16.mxu0 %v1003_v33  ;;  %613 = vmatprep.subr.bf16.mxu1 %v1023_v40  ;;  %s1198_s17 = scalar_lea.vmem %s793_s14, 128  ;;  %p1203_p2 = scmp.lt.s32.totalorder %s793_s14, %s793_s14 }
  0x8c   :  { %v225_v43 = vrot.slane %v212_v24, %v224_v38  ;;  %p1199_p1 = scmp.ne.s32.totalorder %s793_s14, %s1198_s17  ;;  %p1204_p3 = scmp.lt.s32.totalorder %s1198_s17, %s1198_s17 }
  0x8e   :  { %573 = vmatpush1.bf16.msra.mxu0 %v1007_v36  ;;  %614 = vmatpush1.bf16.msra.mxu1 %v1026_v42  ;;  %v229_v36 = vrot.slane %v212_v24, %v228_v28  ;;  %p1205_p4 = por %p1204_p3, %p1203_p2 }
  0x8f   :  { %574 = vmatprep.subr.bf16.mxu0 %v1009_v37  ;;  %615 = vmatprep.subr.bf16.mxu1 %v1029_v44 }
  0x90   :  { %p1206_p5 = pnand %p1205_p4, %p1199_p1 }
  0x92   :  { %575 = vmatpush1.bf16.msra.mxu0 %v1013_v39  ;;  %616 = vmatpush1.bf16.msra.mxu1 %v1032_v56 }
  0x93   :  { %576 = vmatprep.subr.bf16.mxu0 %v1015_v41  ;;  %617 = vmatprep.subr.bf16.mxu1 %v1035_v58 }
  0x96   :  { %577 = vmatpush1.bf16.msra.mxu0 %v1019_v54  ;;  %618 = vmatpush1.bf16.msra.mxu1 %v1038_v60 }
  0x97   :  { %578 = vmatprep.subr.bf16.mxu0 %v1021_v55  ;;  %619 = vmatprep.subr.bf16.mxu1 %v1041_v61 }
  0x9a   :  { %579 = vmatpush1.bf16.msra.mxu0 %v1025_v57  ;;  %620 = vmatpush1.bf16.msra.mxu1 %v1044_v0 }
  0x9b   :  { %580 = vmatprep.subr.bf16.mxu0 %v1027_v59  ;;  %621 = vmatprep.subr.bf16.mxu1 %v1045_v1 }
  0x9e   :  { %581 = vmatpush1.bf16.msra.mxu0 %v1031_v62  ;;  %622 = vmatpush1.bf16.msra.mxu1 %v1047_v4 }
  0x9f   :  { %582 = vmatprep.subr.bf16.mxu0 %v1033_v63  ;;  %623 = vmatprep.subr.bf16.mxu1 %v1048_v5 }
  0xa2   :  { %583 = vmatpush1.bf16.msra.mxu0 %v1037_v2  ;;  %624 = vmatpush1.bf16.msra.mxu1 %v1050_v8 }
  0xa3   :  { %584 = vmatprep.subr.bf16.mxu0 %v1039_v3  ;;  %625 = vmatprep.subr.bf16.mxu1 %v1051_v9 }
  0xa6   :  { %585 = vmatpush1.bf16.msra.mxu0 %v1043_v6  ;;  %626 = vmatpush1.bf16.msra.mxu1 %v1053_v11 }
  0xa7   :  { %921 = vmatprep.subr.bf16.mxu0 %v1288_v13 }
  0xa9   :  { %587 = vmatmul.mubr.bf16.vlgmr.msra.gmra.mrb[0].mxu0 %v146_v10  ;;  %628 = vmatmul.mubr.bf16.vlgmr.msra.gmra.mrb[0].mxu1 %v146_v10 }
  0xaa   :  { %922 = vmatpush3.bf16.msra.mxu0 %v1054_v12  ;;  %937 = vmatprep.mubr.msk.bf16.mxu0 %vm1289_vm0, %v1288_v13 }
  0xab   :  { %923 = vmatprep.subr.bf16.mxu0 %v1288_v13 }
  0xae   :  { %924 = vmatpush3.bf16.msra.mxu0 %v1055_v14 }
  0xaf   :  { %925 = vmatprep.subr.bf16.mxu0 %v1288_v13 }
  0xb2   :  { %926 = vmatpush3.bf16.msra.mxu0 %v1056_v15 }
  0xb3   :  { %927 = vmatprep.subr.bf16.mxu0 %v1288_v13 }
  0xb6   :  { %928 = vmatpush3.bf16.msra.mxu0 %v1057_v16 }
  0xb7   :  { %929 = vmatprep.subr.bf16.mxu0 %v1288_v13 }
  0xba   :  { %930 = vmatpush3.bf16.msra.mxu0 %v1058_v17 }
  0xbb   :  { %931 = vmatprep.subr.bf16.mxu0 %v1288_v13 }
  0xbe   :  { %932 = vmatpush3.bf16.msra.mxu0 %v1059_v18 }
  0xbf   :  { %933 = vmatprep.subr.bf16.mxu0 %v1288_v13 }
  0xc2   :  { %934 = vmatpush3.bf16.msra.mxu0 %v1060_v19 }
  0xc3   :  { %935 = vmatprep.subr.bf16.mxu0 %v1288_v13 }
  0xc6   :  { %936 = vmatpush3.bf16.msra.mxu0 %v1061_v20 }
 0x17c   :  { %v588_v29 = vpop.f32.mrb[0].mxu0  ;;  %v629_v39 = vpop.f32.mrb[0].mxu1 }
 0x17d   :  { %v589_v30 = vadd.f32 %v588_v29, %v217_v26  ;;  %v590_v31 = vpop.f32.mrb[1].mxu0  ;;  %v631_v40 = vpop.f32.mrb[1].mxu1  ;;  %v630_v46 = vadd.f32 %v629_v39, %v225_v43 }
 0x17e   :  { %v591_v32 = vadd.f32 %v590_v31, %v221_v27  ;;  %v592_v33 = vpop.f32.mrb[2].mxu0  ;;  %v632_v41 = vadd.f32 %v631_v40, %v229_v36  ;;  %v633_v42 = vpop.f32.mrb[2].mxu1 }
 0x17f   :  { %v900_v34 = vmul.f32 -1.442695, %v589_v30  ;;  %v593_v35 = vpop.f32.mrb[3].mxu0  ;;  %v634_v44 = vpop.f32.mrb[3].mxu1 }
 0x180   :  { %v901_v37 = vmul.f32 -1.442695, %v591_v32  ;;  %v902_v45 = vmul.f32 -1.442695, %v632_v41 }
 0x181   :  { %1062 = vpow2.f32 %v900_v34 }
 0x182   :  { %1064 = vpow2.f32 %v901_v37 }
 0x183   :  { %1066 = vpow2.f32 %v902_v45 }
 0x184   :  { %1068 = vtanh.f32 %v630_v46 }
 0x18b   :  { %v1063_v47 = vpop.eup %1062 }
 0x18c   :  { %v1065_v48 = vpop.eup %1064  ;;  %v639_v49 = vadd.f32 1.0, %v1063_v47 }
 0x18d   :  { %v645_v50 = vadd.f32 1.0, %v1065_v48  ;;  %v1067_v51 = vpop.eup %1066 }
 0x18e   :  { %1070 = vrcp.f32 %v639_v49  ;;  %v1069_v52 = vpop.eup %1068  ;;  %v652_v55 = vadd.f32 1.0, %v1067_v51 }
 0x18f   :  { %1072 = vrcp.f32 %v645_v50 }
 0x190   :  { %1074 = vrcp.f32 %v652_v55 }
 0x198   :  { %v1071_v54 = vpop.eup %1070 }
 0x199   :  { %v1073_v56 = vpop.eup %1072  ;;  %v657_v57 = vmul.f32 %v1071_v54, %v1069_v52 }
 0x19a   :  { %v656_v58 = vmul.f32 %v1073_v56, %v655_v53  ;;  %v1075_v60 = vpop.eup %1074 }
 0x19c   :  { %v658_v59 = vadd.f32 %v657_v57, %v656_v58 }
 0x19e   :  { %1076 = vtanh.f32 %v658_v59  ;;  %661 = vst [vmem:[#allocation17] sm:$0xff] %v658_v59 }
 0x1a8   :  { %v1077_v61 = vpop.eup %1076 }
 0x1a9   :  { %v660_v62 = vmul.f32 %v1077_v61, %v1075_v60 }
 0x1ab   :  { %v663_v63 = vpack.c.bf16 %v660_v62, %v660_v62  ;;  %662 = vst [vmem:[#allocation15] sm:$0xff] %v660_v62 }
 0x1ad   :  { %938 = vmatmul.mubr.bf16.vlgmr.msra.gmra.mrb[4].mxu0 %v663_v63 }
 0x1ae   :  { %1209 = shalt.err (!%p1206_p5)
}
 0x1af   :  { %s1210_s3 = scalar_lea.hbm %s1502_s9, 128 }
 0x1b0   :  { %p1211_p6 = scmp.ne.s32.totalorder %s1502_s9, %s1210_s3  ;;  %p1214_p7 = scmp.lt.u32.totalorder %s1210_s3, %s1502_s9 }
 0x1b2   :  { %p1216_p8 = pnand %p1214_p7, %p1211_p6 }
 0x1b4   :  { %1219 = shalt.err (!%p1216_p8)
}
 0x1b5   :  { %795 = dma.vmem_to_hbm [thread:$0]  %s793_s14, 128, %s1502_s9, [#allocation16]  }
 0x1b6   :  { %s1291_s23 = smov [#allocation17]  }
 0x1b7   :  { %s802_s24 = sshll.u32 %s1291_s23, 4  ;;  %s803_s24 = int_to_ptr.vmem [resolvable:$true] %s802_s24 }
 0x1b8   :  { %s1220_s25 = scalar_lea.vmem %s803_s24, 128  ;;  %p1225_p10 = scmp.lt.s32.totalorder %s803_s24, %s803_s24 }
 0x1b9   :  { %p1221_p9 = scmp.ne.s32.totalorder %s803_s24, %s1220_s25  ;;  %p1226_p11 = scmp.lt.s32.totalorder %s1220_s25, %s1220_s25 }
 0x1bb   :  { %p1227_p12 = por %p1226_p11, %p1225_p10 }
 0x1bd   :  { %p1228_p13 = pnand %p1227_p12, %p1221_p9 }
 0x1bf   :  { %1231 = shalt.err (!%p1228_p13)
}
 0x1c0   :  { %s1232_s1 = scalar_lea.hbm %s1503_s10, 128 }
 0x1c1   :  { %p1233_p0 = scmp.ne.s32.totalorder %s1503_s10, %s1232_s1  ;;  %p1236_p1 = scmp.lt.u32.totalorder %s1232_s1, %s1503_s10 }
 0x1c3   :  { %p1238_p2 = pnand %p1236_p1, %p1233_p0 }
 0x1c5   :  { %1241 = shalt.err (!%p1238_p2)
}
 0x1c6   :  { %805 = dma.vmem_to_hbm [thread:$0]  %s803_s24, 128, %s1503_s10, [#allocation16]   ;;  %v903_v0 = vld [vmem:[%s1500_s7] ss:$0 sm:$0xff] }
 0x1c7   :  { %s1292_s15 = smov [#allocation14]  }
 0x1c8   :  { %s782_s2 = sshll.u32 %s1292_s15, 4  ;;  %s783_s2 = int_to_ptr.vmem [resolvable:$true] %s782_s2 }
 0x1c9   :  { %s1242_s5 = scalar_lea.vmem %s783_s2, 128  ;;  %p1247_p4 = scmp.lt.s32.totalorder %s783_s2, %s783_s2 }
 0x1ca   :  { %p1243_p3 = scmp.ne.s32.totalorder %s783_s2, %s1242_s5  ;;  %p1248_p5 = scmp.lt.s32.totalorder %s1242_s5, %s1242_s5 }
 0x1cc   :  { %p1249_p6 = por %p1248_p5, %p1247_p4 }
 0x1ce   :  { %p1250_p7 = pnand %p1249_p6, %p1243_p3 }
 0x280   :  { %v769_v1 = vpop.f32.mrb[4].mxu0 }
 0x281   :  { %v770_v2 = vadd.f32 %v903_v0, %v769_v1  ;;  %v939_v3 = vpop.f32.mrb[5].mxu0 }
 0x282   :  { %v772_v4 = vpop.f32.mrb[6].mxu0 }
 0x283   :  { %775 = vst [vmem:[#allocation14] sm:$0xff] %v770_v2  ;;  %v940_v5 = vpop.f32.mrb[7].mxu0 }
 0x284   :  { %1253 = shalt.err (!%p1250_p7)
}
 0x285   :  { %s1254_s7 = scalar_lea.hbm %s1501_s8, 128 }
 0x286   :  { %p1255_p8 = scmp.ne.s32.totalorder %s1501_s8, %s1254_s7  ;;  %p1258_p9 = scmp.lt.u32.totalorder %s1254_s7, %s1501_s8 }
 0x288   :  { %p1260_p10 = pnand %p1258_p9, %p1255_p8 }
 0x28a   :  { %1263 = shalt.err (!%p1260_p10)
}
 0x28b   :  { %785 = dma.vmem_to_hbm [thread:$0]  %s783_s2, 128, %s1501_s8, [#allocation5]  }
 0x28c   :  { %1272 = dma.done.wait [#allocation5], 128  }
 0x28d   :  { %1273 = vsyncadd [#allocation5], 4294967168 }
 0x28e   :  { %1274 = dma.done.wait [#allocation16], 256  }
 0x28f   :  { %1275 = vsyncadd [#allocation16], 4294967040 }
 0x290   :  { %815 = vsyncpa [#allocation4], 1 }
 0x291   :  { %816 = vsyncpa [#allocation9], 1 }
 0x292   :  { %817 = vsyncpa [#allocation12], 1 }
 0x293   :  { %818 = vsyncpa [#allocation5], 1 }
 0x294   :  { %819 = vsyncpa [#allocation16], 1 }
 0x295   :  { %820 = vsyncpa [#allocation6], 1 }

</bundles_post_ra>
